<compile_context>
chip_gen: v5e
topology: v5e:2x2
jax: 0.10.0
libtpu: 0.0.40
codegen_flags: <defaults>
</compile_context>

<pallas_src>
import functools

import jax
import jax.numpy as jnp
from jax.experimental import pallas as pl
from jax.experimental.pallas import tpu as pltpu

HEADS = 2                 # multi_head=True because edge_num(1000) < 1_400_000
GAT_NEG_SLOPE = 0.2       # GATConv internal leaky_relu slope (PyG default)
OUT_NEG_SLOPE = 0.01      # F.leaky_relu default slope used in the cell
LANE = 128                # TPU lane width: pad HBM-facing feature dims to this


def _leaky(x, slope):
    return jnp.where(x >= 0, x, slope * x)


def _round_up(n, m):
    return (n + m - 1) // m * m


def _pad2(a, rows, cols):
    return jnp.pad(a, ((0, rows - a.shape[0]), (0, cols - a.shape[1])))


# --------------------------- fused Pallas kernel ---------------------------
# TODO(synk): for large N this whole-VMEM-resident dense design should switch
# to row-tiled BlockSpecs + online softmax (and a block-sparse gather via
# PrefetchScalarGridSpec for realistic edge counts); fine for small/moderate N.
def fused_forward_kernel(x_ref, adj_ref, s_ref, *rest,
                         num_layers, heads, head_dim, num_class):
    # rest = per-cell weights (8 refs/cell) + [w_cls, b_cls]   (inputs)
    #        + [o_ref]                                          (output)
    #        + [act_ref]  single reused activation slab         (scratch)
    n_w = 8 * num_layers
    cell_refs = rest[:n_w]
    w_cls_ref, b_cls_ref = rest[n_w:n_w + 2]
    o_ref = rest[n_w + 2]
    act = rest[n_w + 3]

    adj = adj_ref[...]            # bf16 {0,1} adjacency mask incl. self loops
    s = s_ref[...]                # bf16 GCN-normalized adjacency (SGConv)
    out_cols = (heads + 1) * head_dim        # logical width of cat([o1, o2])

    # Hoisted once: additive -inf bias for non-edges (f32), reused by every
    # head of every cell.  Exp of (-1e30 - m) underflows to exactly 0.
    neg_bias = jnp.where(adj > 0, 0.0, -1e30)

    # Zero the slab ONCE: real writes only ever touch columns [0, out_cols),
    # so the lane-pad columns stay zero for every cell (they multiply the
    # zero-padded rows of the next cell's weights / the classifier).
    act[...] = jnp.zeros_like(act)

    x_bf = x_ref[...]                        # bf16, lane-padded node features
    for c in range(num_layers):
        (w_pre, b_pre, w_gat, a_src, a_dst, b_gat, w_sg, b_sg) = \
            cell_refs[8 * c:8 * (c + 1)]

        # preprocessor_x: xpre = x @ W + b  (stays resident, reused by GAT & SG)
        xpre = jnp.dot(x_bf, w_pre[...],
                       preferred_element_type=jnp.float32) + b_pre[...]
        xpre_bf = xpre.astype(jnp.bfloat16)

        # ---- GATConv (concat heads), + cell leaky_relu + relu, per-head store
        xp = jnp.dot(xpre_bf, w_gat[...], preferred_element_type=jnp.float32)
        for h in range(heads):
            lo, hi = h * head_dim, (h + 1) * head_dim
            xh = xp[:, lo:hi]                                        # (N, D)
            e_src = jnp.sum(xh * a_src[h:h + 1, :], axis=-1, keepdims=True)
            e_dst = jnp.sum(xh * a_dst[h:h + 1, :], axis=-1, keepdims=True)
            e = _leaky(e_dst + jnp.transpose(e_src), GAT_NEG_SLOPE)  # e[i,j]
            e = e + neg_bias                          # mask non-edges
            m = jnp.max(e, axis=-1, keepdims=True)
            p = jnp.exp(e - m)                        # non-edges underflow to 0
            inv = pl.reciprocal(jnp.sum(p, axis=-1, keepdims=True), approx=True)
            alpha = (p * inv).astype(jnp.bfloat16)
            o1h = jnp.dot(alpha, xh.astype(jnp.bfloat16),
                          preferred_element_type=jnp.float32)
            o1h = o1h + b_gat[:, lo:hi]
            # relu(cat(...)) after leaky_relu; write straight into the slab
            act[:, lo:hi] = jnp.maximum(_leaky(o1h, OUT_NEG_SLOPE), 0.0)

        # ---- SGConv (K=1): lin(S @ xpre), + cell leaky_relu + relu ----
        sx = jnp.dot(s, xpre_bf, preferred_element_type=jnp.float32)
        o2 = jnp.dot(sx.astype(jnp.bfloat16), w_sg[...],
                     preferred_element_type=jnp.float32) + b_sg[...]
        act[:, heads * head_dim:out_cols] = \
            jnp.maximum(_leaky(o2, OUT_NEG_SLOPE), 0.0)

        # next cell consumes this cell's activation (VMEM only, no HBM trip);
        # the load happens before the next cell's stores, so one slab suffices.
        x_bf = act[...].astype(jnp.bfloat16)

    # ---- classifier + log_softmax over the real (unpadded) class columns ----
    logits = jnp.dot(x_bf, w_cls_ref[...],
                     preferred_element_type=jnp.float32) + b_cls_ref[...]
    col = jax.lax.broadcasted_iota(jnp.int32, logits.shape, 1)
    valid = col < num_class
    masked = jnp.where(valid, logits, -1e30)
    m = jnp.max(masked, axis=-1, keepdims=True)
    lse = m + jnp.log(jnp.sum(jnp.exp(masked - m), axis=-1, keepdims=True))
    o_ref[...] = jnp.where(valid, logits - lse, 0.0)


# ---------------- JAX glue: graph densification & parameters ----------------

def build_dense_graph(edge_index, edge_weight, num_nodes):
    src = edge_index[0]
    dst = edge_index[1]
    idx = jnp.arange(num_nodes)
    # GAT adjacency mask (with self loops): adj[i, j] = 1 iff edge j -> i.
    # TODO(synk): duplicate edges / pre-existing self loops collapse to a
    # single dense entry (exact PyG multi-edge attention not reproduced).
    adj = jnp.zeros((num_nodes, num_nodes), jnp.float32).at[dst, src].set(1.0)
    adj = adj.at[idx, idx].set(1.0)
    # SGConv GCN normalization (add self loops w/ weight 1, symmetric norm).
    deg = jnp.zeros((num_nodes,), jnp.float32).at[dst].add(edge_weight) + 1.0
    dis = jax.lax.rsqrt(deg)
    s = jnp.zeros((num_nodes, num_nodes), jnp.float32)
    s = s.at[dst, src].add(edge_weight * dis[dst] * dis[src])
    s = s + jnp.diag(dis * dis)
    # bf16 halves the O(N^2) HBM/VMEM footprint; adj is an exact 0/1 mask.
    return adj.astype(jnp.bfloat16), s.astype(jnp.bfloat16)


def init_params(key, features_num, num_class, num_layers, hidden):
    # Deterministic synthetic init (module shapes only, no checkpoint).
    hidden_dim = max(hidden, num_class * 2)
    output_dim = hidden_dim
    cur_dim = features_num
    cells = []
    for _ in range(num_layers):
        key, *ks = jax.random.split(key, 9)
        cells.append(dict(
            w_pre=jax.random.normal(ks[0], (cur_dim, hidden_dim), jnp.float32) * (cur_dim ** -0.5),
            b_pre=jax.random.normal(ks[1], (1, hidden_dim), jnp.float32) * 0.01,
            w_gat=jax.random.normal(ks[2], (hidden_dim, HEADS * output_dim), jnp.float32) * (hidden_dim ** -0.5),
            att_src=jax.random.normal(ks[3], (HEADS, output_dim), jnp.float32) * (output_dim ** -0.5),
            att_dst=jax.random.normal(ks[4], (HEADS, output_dim), jnp.float32) * (output_dim ** -0.5),
            b_gat=jax.random.normal(ks[5], (1, HEADS * output_dim), jnp.float32) * 0.01,
            w_sg=jax.random.normal(ks[6], (hidden_dim, output_dim), jnp.float32) * (hidden_dim ** -0.5),
            b_sg=jax.random.normal(ks[7], (1, output_dim), jnp.float32) * 0.01,
        ))
        cur_dim = output_dim * (1 + HEADS)   # cell.output_dim
    key, k1, k2 = jax.random.split(key, 3)
    classifier = dict(
        w=jax.random.normal(k1, (cur_dim, num_class), jnp.float32) * (cur_dim ** -0.5),
        b=jax.random.normal(k2, (1, num_class), jnp.float32) * 0.01,
    )
    return dict(cells=cells, classifier=classifier,
                hidden_dim=hidden_dim, output_dim=output_dim)


def nas_autograph_a_forward(params, x, edge_index, edge_weight):
    num_nodes, features_num = x.shape
    output_dim = params["output_dim"]
    num_layers = len(params["cells"])
    num_class = params["classifier"]["w"].shape[1]

    out_cols = (1 + HEADS) * output_dim          # cell.output_dim
    feat_pad = _round_up(features_num, LANE)
    out_pad = _round_up(out_cols, LANE)
    cls_pad = _round_up(num_class, LANE)

    adj_bf, s_bf = build_dense_graph(edge_index, edge_weight, num_nodes)

    # F.dropout(p=0.5) in inference mode (training=False) is the identity.
    # TODO(synk): training-mode dropout randomness is not reproduced.
    # Note: the `h` carry of the original cell is never consumed (dead value).
    x_bf = _pad2(x, num_nodes, feat_pad).astype(jnp.bfloat16)

    args = [x_bf, adj_bf, s_bf]
    for c, cell in enumerate(params["cells"]):
        in_pad = feat_pad if c == 0 else out_pad
        hidden_dim = cell["w_pre"].shape[1]
        args += [
            _pad2(cell["w_pre"], in_pad, hidden_dim).astype(jnp.bfloat16),
            cell["b_pre"],
            cell["w_gat"].astype(jnp.bfloat16),
            cell["att_src"],
            cell["att_dst"],
            cell["b_gat"],
            cell["w_sg"].astype(jnp.bfloat16),
            cell["b_sg"],
        ]
    args += [
        _pad2(params["classifier"]["w"], out_pad, cls_pad).astype(jnp.bfloat16),
        _pad2(params["classifier"]["b"], 1, cls_pad),
    ]

    kernel = functools.partial(
        fused_forward_kernel,
        num_layers=num_layers, heads=HEADS, head_dim=output_dim,
        num_class=num_class)

    out_padded = pl.pallas_call(
        kernel,
        out_shape=jax.ShapeDtypeStruct((num_nodes, cls_pad), jnp.float32),
        in_specs=[pl.BlockSpec(memory_space=pltpu.MemorySpace.VMEM)] * len(args),
        out_specs=pl.BlockSpec(memory_space=pltpu.MemorySpace.VMEM),
        scratch_shapes=[pltpu.VMEM((num_nodes, out_pad), jnp.float32)],
    )(*args)
    return out_padded[:, :num_class]


if __name__ == "__main__":
    key = jax.random.PRNGKey(0)
    features_num, num_class, num_layers, hidden = 16, 4, 2, 32
    num_nodes, num_edges = 8, 16

    kx, kw, kp = jax.random.split(key, 3)
    x = jax.random.normal(kx, (num_nodes, features_num), jnp.float32)
    # Deterministic ring-style edges, no self loops, no duplicates.
    base = jnp.arange(num_nodes, dtype=jnp.int32)
    src = jnp.concatenate([base, base])
    dst = jnp.concatenate([(base + 1) % num_nodes, (base + 3) % num_nodes])
    edge_index = jnp.stack([src, dst]).astype(jnp.int32)        # (2, E)
    edge_weight = jax.random.uniform(kw, (num_edges,), jnp.float32, 0.5, 1.5)

    params = init_params(kp, features_num, num_class, num_layers, hidden)
    out = nas_autograph_a_forward(params, x, edge_index, edge_weight)
    out = jax.block_until_ready(out)

    assert out.shape == (num_nodes, num_class)
    assert bool(jnp.all(jnp.isfinite(out)))
    # rows of exp(log_softmax) should sum to ~1
    assert bool(jnp.allclose(jnp.sum(jnp.exp(out), axis=-1), 1.0, atol=1e-5))
    print("KERNEL_OK")
</pallas_src>

<mosaic_0001>
module attributes {stable_mosaic.version = 11 : i64} {
  func.func @fused_forward_kernel(%arg0: memref<8x128xbf16, #tpu.memory_space<vmem>>, %arg1: memref<8x8xbf16, #tpu.memory_space<vmem>>, %arg2: memref<8x8xbf16, #tpu.memory_space<vmem>>, %arg3: memref<128x32xbf16, #tpu.memory_space<vmem>>, %arg4: memref<1x32xf32, #tpu.memory_space<vmem>>, %arg5: memref<32x64xbf16, #tpu.memory_space<vmem>>, %arg6: memref<2x32xf32, #tpu.memory_space<vmem>>, %arg7: memref<2x32xf32, #tpu.memory_space<vmem>>, %arg8: memref<1x64xf32, #tpu.memory_space<vmem>>, %arg9: memref<32x32xbf16, #tpu.memory_space<vmem>>, %arg10: memref<1x32xf32, #tpu.memory_space<vmem>>, %arg11: memref<128x32xbf16, #tpu.memory_space<vmem>>, %arg12: memref<1x32xf32, #tpu.memory_space<vmem>>, %arg13: memref<32x64xbf16, #tpu.memory_space<vmem>>, %arg14: memref<2x32xf32, #tpu.memory_space<vmem>>, %arg15: memref<2x32xf32, #tpu.memory_space<vmem>>, %arg16: memref<1x64xf32, #tpu.memory_space<vmem>>, %arg17: memref<32x32xbf16, #tpu.memory_space<vmem>>, %arg18: memref<1x32xf32, #tpu.memory_space<vmem>>, %arg19: memref<128x128xbf16, #tpu.memory_space<vmem>>, %arg20: memref<1x128xf32, #tpu.memory_space<vmem>>, %arg21: memref<8x128xf32, #tpu.memory_space<vmem>>, %arg22: memref<8x128xf32, #tpu.memory_space<vmem>>) attributes {dimension_semantics = [], scalar_prefetch = 0 : i64, scratch_operands = 1 : i64, tpu.core_type = #tpu.core_type<tc>} {
    %c0 = arith.constant 0 : index
    %c0_0 = arith.constant 0 : index
    %0 = vector.load %arg1[%c0, %c0_0] : memref<8x8xbf16, #tpu.memory_space<vmem>>, vector<8x8xbf16>
    %c0_1 = arith.constant 0 : index
    %c0_2 = arith.constant 0 : index
    %1 = vector.load %arg2[%c0_1, %c0_2] : memref<8x8xbf16, #tpu.memory_space<vmem>>, vector<8x8xbf16>
    %cst = arith.constant 0.000000e+00 : bf16
    %2 = vector.broadcast %cst : bf16 to vector<8x8xbf16>
    %3 = arith.cmpf ogt, %0, %2 : vector<8x8xbf16>
    %cst_3 = arith.constant 0.000000e+00 : f32
    %cst_4 = arith.constant -1.000000e+30 : f32
    %4 = vector.broadcast %cst_3 : f32 to vector<8x8xf32>
    %5 = vector.broadcast %cst_4 : f32 to vector<8x8xf32>
    %6 = arith.select %3, %4, %5 : vector<8x8xi1>, vector<8x8xf32>
    %cst_5 = arith.constant 0.000000e+00 : f32
    %7 = vector.broadcast %cst_5 : f32 to vector<8x128xf32>
    %c0_6 = arith.constant 0 : index
    %c0_7 = arith.constant 0 : index
    %8 = vector.load %arg22[%c0_6, %c0_7] : memref<8x128xf32, #tpu.memory_space<vmem>>, vector<8x128xf32>
    tpu.vector_store %arg22[%c0_6, %c0_7], %7 {strides = array<i32>} : memref<8x128xf32, #tpu.memory_space<vmem>>, vector<8x128xf32>,
    %c0_8 = arith.constant 0 : index
    %c0_9 = arith.constant 0 : index
    %9 = vector.load %arg0[%c0_8, %c0_9] : memref<8x128xbf16, #tpu.memory_space<vmem>>, vector<8x128xbf16>
    %c0_10 = arith.constant 0 : index
    %c0_11 = arith.constant 0 : index
    %10 = vector.load %arg3[%c0_10, %c0_11] : memref<128x32xbf16, #tpu.memory_space<vmem>>, vector<128x32xbf16>
    %cst_12 = arith.constant dense<0.000000e+00> : vector<8x32xf32>
    %11 = tpu.matmul %9, %10, %cst_12 {dimension_numbers = #tpu.dot_dimension_numbers<[1], [0], [0], [1], [0, 0, 1, 1], [], []>} : vector<8x128xbf16>, vector<128x32xbf16>, vector<8x32xf32> -> vector<8x32xf32>
    %c0_13 = arith.constant 0 : index
    %c0_14 = arith.constant 0 : index
    %12 = vector.load %arg4[%c0_13, %c0_14] : memref<1x32xf32, #tpu.memory_space<vmem>>, vector<1x32xf32>
    %13 = vector.broadcast %12 : vector<1x32xf32> to vector<8x32xf32>
    %14 = arith.addf %11, %13 : vector<8x32xf32>
    %15 = arith.truncf %14 : vector<8x32xf32> to vector<8x32xbf16>
    %c0_15 = arith.constant 0 : index
    %c0_16 = arith.constant 0 : index
    %16 = vector.load %arg5[%c0_15, %c0_16] : memref<32x64xbf16, #tpu.memory_space<vmem>>, vector<32x64xbf16>
    %cst_17 = arith.constant dense<0.000000e+00> : vector<8x64xf32>
    %17 = tpu.matmul %15, %16, %cst_17 {dimension_numbers = #tpu.dot_dimension_numbers<[1], [0], [0], [1], [0, 0, 1, 1], [], []>} : vector<8x32xbf16>, vector<32x64xbf16>, vector<8x64xf32> -> vector<8x64xf32>
    %18 = vector.extract_strided_slice %17 {offsets = [0, 0], sizes = [8, 32], strides = [1, 1]} : vector<8x64xf32> to vector<8x32xf32>
    %c0_18 = arith.constant 0 : index
    %c0_19 = arith.constant 0 : index
    %19 = vector.load %arg6[%c0_18, %c0_19] : memref<2x32xf32, #tpu.memory_space<vmem>>, vector<1x32xf32>
    %20 = vector.broadcast %19 : vector<1x32xf32> to vector<8x32xf32>
    %21 = arith.mulf %18, %20 : vector<8x32xf32>
    %cst_20 = arith.constant dense<0.000000e+00> : vector<8xf32>
    %22 = vector.multi_reduction <add>, %21, %cst_20 [1] : vector<8x32xf32> to vector<8xf32>
    %23 = vector.shape_cast %22 : vector<8xf32> to vector<8x1xf32>
    %c0_21 = arith.constant 0 : index
    %c0_22 = arith.constant 0 : index
    %24 = vector.load %arg7[%c0_21, %c0_22] : memref<2x32xf32, #tpu.memory_space<vmem>>, vector<1x32xf32>
    %25 = vector.broadcast %24 : vector<1x32xf32> to vector<8x32xf32>
    %26 = arith.mulf %18, %25 : vector<8x32xf32>
    %cst_23 = arith.constant dense<0.000000e+00> : vector<8xf32>
    %27 = vector.multi_reduction <add>, %26, %cst_23 [1] : vector<8x32xf32> to vector<8xf32>
    %28 = vector.shape_cast %27 : vector<8xf32> to vector<8x1xf32>
    %29 = tpu.transpose %23, [1, 0] : vector<8x1xf32> -> vector<1x8xf32>
    %30 = vector.broadcast %28 : vector<8x1xf32> to vector<8x8xf32>
    %31 = vector.broadcast %29 : vector<1x8xf32> to vector<8x8xf32>
    %32 = arith.addf %30, %31 : vector<8x8xf32>
    %cst_24 = arith.constant 0.000000e+00 : f32
    %33 = vector.broadcast %cst_24 : f32 to vector<8x8xf32>
    %34 = arith.cmpf oge, %32, %33 : vector<8x8xf32>
    %cst_25 = arith.constant 2.000000e-01 : f32
    %35 = vector.broadcast %cst_25 : f32 to vector<8x8xf32>
    %36 = arith.mulf %35, %32 : vector<8x8xf32>
    %37 = arith.select %34, %32, %36 : vector<8x8xi1>, vector<8x8xf32>
    %38 = arith.addf %37, %6 : vector<8x8xf32>
    %cst_26 = arith.constant dense<0xFF800000> : vector<8xf32>
    %39 = vector.multi_reduction <maximumf>, %38, %cst_26 [1] : vector<8x8xf32> to vector<8xf32>
    %40 = vector.shape_cast %39 : vector<8xf32> to vector<8x1xf32>
    %41 = vector.broadcast %40 : vector<8x1xf32> to vector<8x8xf32>
    %42 = arith.subf %38, %41 : vector<8x8xf32>
    %43 = math.exp %42 : vector<8x8xf32>
    %cst_27 = arith.constant dense<0.000000e+00> : vector<8xf32>
    %44 = vector.multi_reduction <add>, %43, %cst_27 [1] : vector<8x8xf32> to vector<8xf32>
    %45 = vector.shape_cast %44 : vector<8xf32> to vector<8x1xf32>
    %46 = tpu.reciprocal %45 {approx = true} : vector<8x1xf32> -> vector<8x1xf32>
    %47 = vector.broadcast %46 : vector<8x1xf32> to vector<8x8xf32>
    %48 = arith.mulf %43, %47 : vector<8x8xf32>
    %49 = arith.truncf %48 : vector<8x8xf32> to vector<8x8xbf16>
    %50 = arith.truncf %18 : vector<8x32xf32> to vector<8x32xbf16>
    %cst_28 = arith.constant dense<0.000000e+00> : vector<8x32xf32>
    %51 = tpu.matmul %49, %50, %cst_28 {dimension_numbers = #tpu.dot_dimension_numbers<[1], [0], [0], [1], [0, 0, 1, 1], [], []>} : vector<8x8xbf16>, vector<8x32xbf16>, vector<8x32xf32> -> vector<8x32xf32>
    %c0_29 = arith.constant 0 : index
    %c0_30 = arith.constant 0 : index
    %52 = vector.load %arg8[%c0_29, %c0_30] : memref<1x64xf32, #tpu.memory_space<vmem>>, vector<1x32xf32>
    %53 = vector.broadcast %52 : vector<1x32xf32> to vector<8x32xf32>
    %54 = arith.addf %51, %53 : vector<8x32xf32>
    %cst_31 = arith.constant 0.000000e+00 : f32
    %55 = vector.broadcast %cst_31 : f32 to vector<8x32xf32>
    %56 = arith.cmpf oge, %54, %55 : vector<8x32xf32>
    %cst_32 = arith.constant 0.00999999977 : f32
    %57 = vector.broadcast %cst_32 : f32 to vector<8x32xf32>
    %58 = arith.mulf %57, %54 : vector<8x32xf32>
    %59 = arith.select %56, %54, %58 : vector<8x32xi1>, vector<8x32xf32>
    %cst_33 = arith.constant 0.000000e+00 : f32
    %60 = vector.broadcast %cst_33 : f32 to vector<8x32xf32>
    %61 = arith.maximumf %59, %60 : vector<8x32xf32>
    %c0_34 = arith.constant 0 : index
    %c0_35 = arith.constant 0 : index
    %62 = vector.load %arg22[%c0_34, %c0_35] : memref<8x128xf32, #tpu.memory_space<vmem>>, vector<8x32xf32>
    tpu.vector_store %arg22[%c0_34, %c0_35], %61 {strides = array<i32>} : memref<8x128xf32, #tpu.memory_space<vmem>>, vector<8x32xf32>,
    %63 = vector.extract_strided_slice %17 {offsets = [0, 32], sizes = [8, 32], strides = [1, 1]} : vector<8x64xf32> to vector<8x32xf32>
    %c1 = arith.constant 1 : index
    %c0_36 = arith.constant 0 : index
    %64 = vector.load %arg6[%c1, %c0_36] : memref<2x32xf32, #tpu.memory_space<vmem>>, vector<1x32xf32>
    %65 = vector.broadcast %64 : vector<1x32xf32> to vector<8x32xf32>
    %66 = arith.mulf %63, %65 : vector<8x32xf32>
    %cst_37 = arith.constant dense<0.000000e+00> : vector<8xf32>
    %67 = vector.multi_reduction <add>, %66, %cst_37 [1] : vector<8x32xf32> to vector<8xf32>
    %68 = vector.shape_cast %67 : vector<8xf32> to vector<8x1xf32>
    %c1_38 = arith.constant 1 : index
    %c0_39 = arith.constant 0 : index
    %69 = vector.load %arg7[%c1_38, %c0_39] : memref<2x32xf32, #tpu.memory_space<vmem>>, vector<1x32xf32>
    %70 = vector.broadcast %69 : vector<1x32xf32> to vector<8x32xf32>
    %71 = arith.mulf %63, %70 : vector<8x32xf32>
    %cst_40 = arith.constant dense<0.000000e+00> : vector<8xf32>
    %72 = vector.multi_reduction <add>, %71, %cst_40 [1] : vector<8x32xf32> to vector<8xf32>
    %73 = vector.shape_cast %72 : vector<8xf32> to vector<8x1xf32>
    %74 = tpu.transpose %68, [1, 0] : vector<8x1xf32> -> vector<1x8xf32>
    %75 = vector.broadcast %73 : vector<8x1xf32> to vector<8x8xf32>
    %76 = vector.broadcast %74 : vector<1x8xf32> to vector<8x8xf32>
    %77 = arith.addf %75, %76 : vector<8x8xf32>
    %cst_41 = arith.constant 0.000000e+00 : f32
    %78 = vector.broadcast %cst_41 : f32 to vector<8x8xf32>
    %79 = arith.cmpf oge, %77, %78 : vector<8x8xf32>
    %cst_42 = arith.constant 2.000000e-01 : f32
    %80 = vector.broadcast %cst_42 : f32 to vector<8x8xf32>
    %81 = arith.mulf %80, %77 : vector<8x8xf32>
    %82 = arith.select %79, %77, %81 : vector<8x8xi1>, vector<8x8xf32>
    %83 = arith.addf %82, %6 : vector<8x8xf32>
    %cst_43 = arith.constant dense<0xFF800000> : vector<8xf32>
    %84 = vector.multi_reduction <maximumf>, %83, %cst_43 [1] : vector<8x8xf32> to vector<8xf32>
    %85 = vector.shape_cast %84 : vector<8xf32> to vector<8x1xf32>
    %86 = vector.broadcast %85 : vector<8x1xf32> to vector<8x8xf32>
    %87 = arith.subf %83, %86 : vector<8x8xf32>
    %88 = math.exp %87 : vector<8x8xf32>
    %cst_44 = arith.constant dense<0.000000e+00> : vector<8xf32>
    %89 = vector.multi_reduction <add>, %88, %cst_44 [1] : vector<8x8xf32> to vector<8xf32>
    %90 = vector.shape_cast %89 : vector<8xf32> to vector<8x1xf32>
    %91 = tpu.reciprocal %90 {approx = true} : vector<8x1xf32> -> vector<8x1xf32>
    %92 = vector.broadcast %91 : vector<8x1xf32> to vector<8x8xf32>
    %93 = arith.mulf %88, %92 : vector<8x8xf32>
    %94 = arith.truncf %93 : vector<8x8xf32> to vector<8x8xbf16>
    %95 = arith.truncf %63 : vector<8x32xf32> to vector<8x32xbf16>
    %cst_45 = arith.constant dense<0.000000e+00> : vector<8x32xf32>
    %96 = tpu.matmul %94, %95, %cst_45 {dimension_numbers = #tpu.dot_dimension_numbers<[1], [0], [0], [1], [0, 0, 1, 1], [], []>} : vector<8x8xbf16>, vector<8x32xbf16>, vector<8x32xf32> -> vector<8x32xf32>
    %c0_46 = arith.constant 0 : index
    %c32 = arith.constant 32 : index
    %97 = vector.load %arg8[%c0_46, %c32] : memref<1x64xf32, #tpu.memory_space<vmem>>, vector<1x32xf32>
    %98 = vector.broadcast %97 : vector<1x32xf32> to vector<8x32xf32>
    %99 = arith.addf %96, %98 : vector<8x32xf32>
    %cst_47 = arith.constant 0.000000e+00 : f32
    %100 = vector.broadcast %cst_47 : f32 to vector<8x32xf32>
    %101 = arith.cmpf oge, %99, %100 : vector<8x32xf32>
    %cst_48 = arith.constant 0.00999999977 : f32
    %102 = vector.broadcast %cst_48 : f32 to vector<8x32xf32>
    %103 = arith.mulf %102, %99 : vector<8x32xf32>
    %104 = arith.select %101, %99, %103 : vector<8x32xi1>, vector<8x32xf32>
    %cst_49 = arith.constant 0.000000e+00 : f32
    %105 = vector.broadcast %cst_49 : f32 to vector<8x32xf32>
    %106 = arith.maximumf %104, %105 : vector<8x32xf32>
    %c0_50 = arith.constant 0 : index
    %c32_51 = arith.constant 32 : index
    %107 = vector.load %arg22[%c0_50, %c32_51] : memref<8x128xf32, #tpu.memory_space<vmem>>, vector<8x32xf32>
    tpu.vector_store %arg22[%c0_50, %c32_51], %106 {strides = array<i32>} : memref<8x128xf32, #tpu.memory_space<vmem>>, vector<8x32xf32>,
    %cst_52 = arith.constant dense<0.000000e+00> : vector<8x32xf32>
    %108 = tpu.matmul %1, %15, %cst_52 {dimension_numbers = #tpu.dot_dimension_numbers<[1], [0], [0], [1], [0, 0, 1, 1], [], []>} : vector<8x8xbf16>, vector<8x32xbf16>, vector<8x32xf32> -> vector<8x32xf32>
    %109 = arith.truncf %108 : vector<8x32xf32> to vector<8x32xbf16>
    %c0_53 = arith.constant 0 : index
    %c0_54 = arith.constant 0 : index
    %110 = vector.load %arg9[%c0_53, %c0_54] : memref<32x32xbf16, #tpu.memory_space<vmem>>, vector<32x32xbf16>
    %cst_55 = arith.constant dense<0.000000e+00> : vector<8x32xf32>
    %111 = tpu.matmul %109, %110, %cst_55 {dimension_numbers = #tpu.dot_dimension_numbers<[1], [0], [0], [1], [0, 0, 1, 1], [], []>} : vector<8x32xbf16>, vector<32x32xbf16>, vector<8x32xf32> -> vector<8x32xf32>
    %c0_56 = arith.constant 0 : index
    %c0_57 = arith.constant 0 : index
    %112 = vector.load %arg10[%c0_56, %c0_57] : memref<1x32xf32, #tpu.memory_space<vmem>>, vector<1x32xf32>
    %113 = vector.broadcast %112 : vector<1x32xf32> to vector<8x32xf32>
    %114 = arith.addf %111, %113 : vector<8x32xf32>
    %cst_58 = arith.constant 0.000000e+00 : f32
    %115 = vector.broadcast %cst_58 : f32 to vector<8x32xf32>
    %116 = arith.cmpf oge, %114, %115 : vector<8x32xf32>
    %cst_59 = arith.constant 0.00999999977 : f32
    %117 = vector.broadcast %cst_59 : f32 to vector<8x32xf32>
    %118 = arith.mulf %117, %114 : vector<8x32xf32>
    %119 = arith.select %116, %114, %118 : vector<8x32xi1>, vector<8x32xf32>
    %cst_60 = arith.constant 0.000000e+00 : f32
    %120 = vector.broadcast %cst_60 : f32 to vector<8x32xf32>
    %121 = arith.maximumf %119, %120 : vector<8x32xf32>
    %c0_61 = arith.constant 0 : index
    %c64 = arith.constant 64 : index
    %122 = vector.load %arg22[%c0_61, %c64] : memref<8x128xf32, #tpu.memory_space<vmem>>, vector<8x32xf32>
    tpu.vector_store %arg22[%c0_61, %c64], %121 {strides = array<i32>} : memref<8x128xf32, #tpu.memory_space<vmem>>, vector<8x32xf32>,
    %c0_62 = arith.constant 0 : index
    %c0_63 = arith.constant 0 : index
    %123 = vector.load %arg22[%c0_62, %c0_63] : memref<8x128xf32, #tpu.memory_space<vmem>>, vector<8x128xf32>
    %124 = arith.truncf %123 : vector<8x128xf32> to vector<8x128xbf16>
    %c0_64 = arith.constant 0 : index
    %c0_65 = arith.constant 0 : index
    %125 = vector.load %arg11[%c0_64, %c0_65] : memref<128x32xbf16, #tpu.memory_space<vmem>>, vector<128x32xbf16>
    %cst_66 = arith.constant dense<0.000000e+00> : vector<8x32xf32>
    %126 = tpu.matmul %124, %125, %cst_66 {dimension_numbers = #tpu.dot_dimension_numbers<[1], [0], [0], [1], [0, 0, 1, 1], [], []>} : vector<8x128xbf16>, vector<128x32xbf16>, vector<8x32xf32> -> vector<8x32xf32>
    %c0_67 = arith.constant 0 : index
    %c0_68 = arith.constant 0 : index
    %127 = vector.load %arg12[%c0_67, %c0_68] : memref<1x32xf32, #tpu.memory_space<vmem>>, vector<1x32xf32>
    %128 = vector.broadcast %127 : vector<1x32xf32> to vector<8x32xf32>
    %129 = arith.addf %126, %128 : vector<8x32xf32>
    %130 = arith.truncf %129 : vector<8x32xf32> to vector<8x32xbf16>
    %c0_69 = arith.constant 0 : index
    %c0_70 = arith.constant 0 : index
    %131 = vector.load %arg13[%c0_69, %c0_70] : memref<32x64xbf16, #tpu.memory_space<vmem>>, vector<32x64xbf16>
    %cst_71 = arith.constant dense<0.000000e+00> : vector<8x64xf32>
    %132 = tpu.matmul %130, %131, %cst_71 {dimension_numbers = #tpu.dot_dimension_numbers<[1], [0], [0], [1], [0, 0, 1, 1], [], []>} : vector<8x32xbf16>, vector<32x64xbf16>, vector<8x64xf32> -> vector<8x64xf32>
    %133 = vector.extract_strided_slice %132 {offsets = [0, 0], sizes = [8, 32], strides = [1, 1]} : vector<8x64xf32> to vector<8x32xf32>
    %c0_72 = arith.constant 0 : index
    %c0_73 = arith.constant 0 : index
    %134 = vector.load %arg14[%c0_72, %c0_73] : memref<2x32xf32, #tpu.memory_space<vmem>>, vector<1x32xf32>
    %135 = vector.broadcast %134 : vector<1x32xf32> to vector<8x32xf32>
    %136 = arith.mulf %133, %135 : vector<8x32xf32>
    %cst_74 = arith.constant dense<0.000000e+00> : vector<8xf32>
    %137 = vector.multi_reduction <add>, %136, %cst_74 [1] : vector<8x32xf32> to vector<8xf32>
    %138 = vector.shape_cast %137 : vector<8xf32> to vector<8x1xf32>
    %c0_75 = arith.constant 0 : index
    %c0_76 = arith.constant 0 : index
    %139 = vector.load %arg15[%c0_75, %c0_76] : memref<2x32xf32, #tpu.memory_space<vmem>>, vector<1x32xf32>
    %140 = vector.broadcast %139 : vector<1x32xf32> to vector<8x32xf32>
    %141 = arith.mulf %133, %140 : vector<8x32xf32>
    %cst_77 = arith.constant dense<0.000000e+00> : vector<8xf32>
    %142 = vector.multi_reduction <add>, %141, %cst_77 [1] : vector<8x32xf32> to vector<8xf32>
    %143 = vector.shape_cast %142 : vector<8xf32> to vector<8x1xf32>
    %144 = tpu.transpose %138, [1, 0] : vector<8x1xf32> -> vector<1x8xf32>
    %145 = vector.broadcast %143 : vector<8x1xf32> to vector<8x8xf32>
    %146 = vector.broadcast %144 : vector<1x8xf32> to vector<8x8xf32>
    %147 = arith.addf %145, %146 : vector<8x8xf32>
    %cst_78 = arith.constant 0.000000e+00 : f32
    %148 = vector.broadcast %cst_78 : f32 to vector<8x8xf32>
    %149 = arith.cmpf oge, %147, %148 : vector<8x8xf32>
    %cst_79 = arith.constant 2.000000e-01 : f32
    %150 = vector.broadcast %cst_79 : f32 to vector<8x8xf32>
    %151 = arith.mulf %150, %147 : vector<8x8xf32>
    %152 = arith.select %149, %147, %151 : vector<8x8xi1>, vector<8x8xf32>
    %153 = arith.addf %152, %6 : vector<8x8xf32>
    %cst_80 = arith.constant dense<0xFF800000> : vector<8xf32>
    %154 = vector.multi_reduction <maximumf>, %153, %cst_80 [1] : vector<8x8xf32> to vector<8xf32>
    %155 = vector.shape_cast %154 : vector<8xf32> to vector<8x1xf32>
    %156 = vector.broadcast %155 : vector<8x1xf32> to vector<8x8xf32>
    %157 = arith.subf %153, %156 : vector<8x8xf32>
    %158 = math.exp %157 : vector<8x8xf32>
    %cst_81 = arith.constant dense<0.000000e+00> : vector<8xf32>
    %159 = vector.multi_reduction <add>, %158, %cst_81 [1] : vector<8x8xf32> to vector<8xf32>
    %160 = vector.shape_cast %159 : vector<8xf32> to vector<8x1xf32>
    %161 = tpu.reciprocal %160 {approx = true} : vector<8x1xf32> -> vector<8x1xf32>
    %162 = vector.broadcast %161 : vector<8x1xf32> to vector<8x8xf32>
    %163 = arith.mulf %158, %162 : vector<8x8xf32>
    %164 = arith.truncf %163 : vector<8x8xf32> to vector<8x8xbf16>
    %165 = arith.truncf %133 : vector<8x32xf32> to vector<8x32xbf16>
    %cst_82 = arith.constant dense<0.000000e+00> : vector<8x32xf32>
    %166 = tpu.matmul %164, %165, %cst_82 {dimension_numbers = #tpu.dot_dimension_numbers<[1], [0], [0], [1], [0, 0, 1, 1], [], []>} : vector<8x8xbf16>, vector<8x32xbf16>, vector<8x32xf32> -> vector<8x32xf32>
    %c0_83 = arith.constant 0 : index
    %c0_84 = arith.constant 0 : index
    %167 = vector.load %arg16[%c0_83, %c0_84] : memref<1x64xf32, #tpu.memory_space<vmem>>, vector<1x32xf32>
    %168 = vector.broadcast %167 : vector<1x32xf32> to vector<8x32xf32>
    %169 = arith.addf %166, %168 : vector<8x32xf32>
    %cst_85 = arith.constant 0.000000e+00 : f32
    %170 = vector.broadcast %cst_85 : f32 to vector<8x32xf32>
    %171 = arith.cmpf oge, %169, %170 : vector<8x32xf32>
    %cst_86 = arith.constant 0.00999999977 : f32
    %172 = vector.broadcast %cst_86 : f32 to vector<8x32xf32>
    %173 = arith.mulf %172, %169 : vector<8x32xf32>
    %174 = arith.select %171, %169, %173 : vector<8x32xi1>, vector<8x32xf32>
    %cst_87 = arith.constant 0.000000e+00 : f32
    %175 = vector.broadcast %cst_87 : f32 to vector<8x32xf32>
    %176 = arith.maximumf %174, %175 : vector<8x32xf32>
    %c0_88 = arith.constant 0 : index
    %c0_89 = arith.constant 0 : index
    %177 = vector.load %arg22[%c0_88, %c0_89] : memref<8x128xf32, #tpu.memory_space<vmem>>, vector<8x32xf32>
    tpu.vector_store %arg22[%c0_88, %c0_89], %176 {strides = array<i32>} : memref<8x128xf32, #tpu.memory_space<vmem>>, vector<8x32xf32>,
    %178 = vector.extract_strided_slice %132 {offsets = [0, 32], sizes = [8, 32], strides = [1, 1]} : vector<8x64xf32> to vector<8x32xf32>
    %c1_90 = arith.constant 1 : index
    %c0_91 = arith.constant 0 : index
    %179 = vector.load %arg14[%c1_90, %c0_91] : memref<2x32xf32, #tpu.memory_space<vmem>>, vector<1x32xf32>
    %180 = vector.broadcast %179 : vector<1x32xf32> to vector<8x32xf32>
    %181 = arith.mulf %178, %180 : vector<8x32xf32>
    %cst_92 = arith.constant dense<0.000000e+00> : vector<8xf32>
    %182 = vector.multi_reduction <add>, %181, %cst_92 [1] : vector<8x32xf32> to vector<8xf32>
    %183 = vector.shape_cast %182 : vector<8xf32> to vector<8x1xf32>
    %c1_93 = arith.constant 1 : index
    %c0_94 = arith.constant 0 : index
    %184 = vector.load %arg15[%c1_93, %c0_94] : memref<2x32xf32, #tpu.memory_space<vmem>>, vector<1x32xf32>
    %185 = vector.broadcast %184 : vector<1x32xf32> to vector<8x32xf32>
    %186 = arith.mulf %178, %185 : vector<8x32xf32>
    %cst_95 = arith.constant dense<0.000000e+00> : vector<8xf32>
    %187 = vector.multi_reduction <add>, %186, %cst_95 [1] : vector<8x32xf32> to vector<8xf32>
    %188 = vector.shape_cast %187 : vector<8xf32> to vector<8x1xf32>
    %189 = tpu.transpose %183, [1, 0] : vector<8x1xf32> -> vector<1x8xf32>
    %190 = vector.broadcast %188 : vector<8x1xf32> to vector<8x8xf32>
    %191 = vector.broadcast %189 : vector<1x8xf32> to vector<8x8xf32>
    %192 = arith.addf %190, %191 : vector<8x8xf32>
    %cst_96 = arith.constant 0.000000e+00 : f32
    %193 = vector.broadcast %cst_96 : f32 to vector<8x8xf32>
    %194 = arith.cmpf oge, %192, %193 : vector<8x8xf32>
    %cst_97 = arith.constant 2.000000e-01 : f32
    %195 = vector.broadcast %cst_97 : f32 to vector<8x8xf32>
    %196 = arith.mulf %195, %192 : vector<8x8xf32>
    %197 = arith.select %194, %192, %196 : vector<8x8xi1>, vector<8x8xf32>
    %198 = arith.addf %197, %6 : vector<8x8xf32>
    %cst_98 = arith.constant dense<0xFF800000> : vector<8xf32>
    %199 = vector.multi_reduction <maximumf>, %198, %cst_98 [1] : vector<8x8xf32> to vector<8xf32>
    %200 = vector.shape_cast %199 : vector<8xf32> to vector<8x1xf32>
    %201 = vector.broadcast %200 : vector<8x1xf32> to vector<8x8xf32>
    %202 = arith.subf %198, %201 : vector<8x8xf32>
    %203 = math.exp %202 : vector<8x8xf32>
    %cst_99 = arith.constant dense<0.000000e+00> : vector<8xf32>
    %204 = vector.multi_reduction <add>, %203, %cst_99 [1] : vector<8x8xf32> to vector<8xf32>
    %205 = vector.shape_cast %204 : vector<8xf32> to vector<8x1xf32>
    %206 = tpu.reciprocal %205 {approx = true} : vector<8x1xf32> -> vector<8x1xf32>
    %207 = vector.broadcast %206 : vector<8x1xf32> to vector<8x8xf32>
    %208 = arith.mulf %203, %207 : vector<8x8xf32>
    %209 = arith.truncf %208 : vector<8x8xf32> to vector<8x8xbf16>
    %210 = arith.truncf %178 : vector<8x32xf32> to vector<8x32xbf16>
    %cst_100 = arith.constant dense<0.000000e+00> : vector<8x32xf32>
    %211 = tpu.matmul %209, %210, %cst_100 {dimension_numbers = #tpu.dot_dimension_numbers<[1], [0], [0], [1], [0, 0, 1, 1], [], []>} : vector<8x8xbf16>, vector<8x32xbf16>, vector<8x32xf32> -> vector<8x32xf32>
    %c0_101 = arith.constant 0 : index
    %c32_102 = arith.constant 32 : index
    %212 = vector.load %arg16[%c0_101, %c32_102] : memref<1x64xf32, #tpu.memory_space<vmem>>, vector<1x32xf32>
    %213 = vector.broadcast %212 : vector<1x32xf32> to vector<8x32xf32>
    %214 = arith.addf %211, %213 : vector<8x32xf32>
    %cst_103 = arith.constant 0.000000e+00 : f32
    %215 = vector.broadcast %cst_103 : f32 to vector<8x32xf32>
    %216 = arith.cmpf oge, %214, %215 : vector<8x32xf32>
    %cst_104 = arith.constant 0.00999999977 : f32
    %217 = vector.broadcast %cst_104 : f32 to vector<8x32xf32>
    %218 = arith.mulf %217, %214 : vector<8x32xf32>
    %219 = arith.select %216, %214, %218 : vector<8x32xi1>, vector<8x32xf32>
    %cst_105 = arith.constant 0.000000e+00 : f32
    %220 = vector.broadcast %cst_105 : f32 to vector<8x32xf32>
    %221 = arith.maximumf %219, %220 : vector<8x32xf32>
    %c0_106 = arith.constant 0 : index
    %c32_107 = arith.constant 32 : index
    %222 = vector.load %arg22[%c0_106, %c32_107] : memref<8x128xf32, #tpu.memory_space<vmem>>, vector<8x32xf32>
    tpu.vector_store %arg22[%c0_106, %c32_107], %221 {strides = array<i32>} : memref<8x128xf32, #tpu.memory_space<vmem>>, vector<8x32xf32>,
    %cst_108 = arith.constant dense<0.000000e+00> : vector<8x32xf32>
    %223 = tpu.matmul %1, %130, %cst_108 {dimension_numbers = #tpu.dot_dimension_numbers<[1], [0], [0], [1], [0, 0, 1, 1], [], []>} : vector<8x8xbf16>, vector<8x32xbf16>, vector<8x32xf32> -> vector<8x32xf32>
    %224 = arith.truncf %223 : vector<8x32xf32> to vector<8x32xbf16>
    %c0_109 = arith.constant 0 : index
    %c0_110 = arith.constant 0 : index
    %225 = vector.load %arg17[%c0_109, %c0_110] : memref<32x32xbf16, #tpu.memory_space<vmem>>, vector<32x32xbf16>
    %cst_111 = arith.constant dense<0.000000e+00> : vector<8x32xf32>
    %226 = tpu.matmul %224, %225, %cst_111 {dimension_numbers = #tpu.dot_dimension_numbers<[1], [0], [0], [1], [0, 0, 1, 1], [], []>} : vector<8x32xbf16>, vector<32x32xbf16>, vector<8x32xf32> -> vector<8x32xf32>
    %c0_112 = arith.constant 0 : index
    %c0_113 = arith.constant 0 : index
    %227 = vector.load %arg18[%c0_112, %c0_113] : memref<1x32xf32, #tpu.memory_space<vmem>>, vector<1x32xf32>
    %228 = vector.broadcast %227 : vector<1x32xf32> to vector<8x32xf32>
    %229 = arith.addf %226, %228 : vector<8x32xf32>
    %cst_114 = arith.constant 0.000000e+00 : f32
    %230 = vector.broadcast %cst_114 : f32 to vector<8x32xf32>
    %231 = arith.cmpf oge, %229, %230 : vector<8x32xf32>
    %cst_115 = arith.constant 0.00999999977 : f32
    %232 = vector.broadcast %cst_115 : f32 to vector<8x32xf32>
    %233 = arith.mulf %232, %229 : vector<8x32xf32>
    %234 = arith.select %231, %229, %233 : vector<8x32xi1>, vector<8x32xf32>
    %cst_116 = arith.constant 0.000000e+00 : f32
    %235 = vector.broadcast %cst_116 : f32 to vector<8x32xf32>
    %236 = arith.maximumf %234, %235 : vector<8x32xf32>
    %c0_117 = arith.constant 0 : index
    %c64_118 = arith.constant 64 : index
    %237 = vector.load %arg22[%c0_117, %c64_118] : memref<8x128xf32, #tpu.memory_space<vmem>>, vector<8x32xf32>
    tpu.vector_store %arg22[%c0_117, %c64_118], %236 {strides = array<i32>} : memref<8x128xf32, #tpu.memory_space<vmem>>, vector<8x32xf32>,
    %c0_119 = arith.constant 0 : index
    %c0_120 = arith.constant 0 : index
    %238 = vector.load %arg22[%c0_119, %c0_120] : memref<8x128xf32, #tpu.memory_space<vmem>>, vector<8x128xf32>
    %239 = arith.truncf %238 : vector<8x128xf32> to vector<8x128xbf16>
    %c0_121 = arith.constant 0 : index
    %c0_122 = arith.constant 0 : index
    %240 = vector.load %arg19[%c0_121, %c0_122] : memref<128x128xbf16, #tpu.memory_space<vmem>>, vector<128x128xbf16>
    %cst_123 = arith.constant dense<0.000000e+00> : vector<8x128xf32>
    %241 = tpu.matmul %239, %240, %cst_123 {dimension_numbers = #tpu.dot_dimension_numbers<[1], [0], [0], [1], [0, 0, 1, 1], [], []>} : vector<8x128xbf16>, vector<128x128xbf16>, vector<8x128xf32> -> vector<8x128xf32>
    %c0_124 = arith.constant 0 : index
    %c0_125 = arith.constant 0 : index
    %242 = vector.load %arg20[%c0_124, %c0_125] : memref<1x128xf32, #tpu.memory_space<vmem>>, vector<1x128xf32>
    %243 = vector.broadcast %242 : vector<1x128xf32> to vector<8x128xf32>
    %244 = arith.addf %241, %243 : vector<8x128xf32>
    %245 = tpu.iota {dimensions = array<i32: 1>} : vector<8x128xi32>
    %c4_i32 = arith.constant 4 : i32
    %246 = vector.broadcast %c4_i32 : i32 to vector<8x128xi32>
    %247 = arith.cmpi slt, %245, %246 : vector<8x128xi32>
    %cst_126 = arith.constant -1.000000e+30 : f32
    %248 = vector.broadcast %cst_126 : f32 to vector<8x128xf32>
    %249 = arith.select %247, %244, %248 : vector<8x128xi1>, vector<8x128xf32>
    %cst_127 = arith.constant dense<0xFF800000> : vector<8xf32>
    %250 = vector.multi_reduction <maximumf>, %249, %cst_127 [1] : vector<8x128xf32> to vector<8xf32>
    %251 = vector.shape_cast %250 : vector<8xf32> to vector<8x1xf32>
    %252 = vector.broadcast %251 : vector<8x1xf32> to vector<8x128xf32>
    %253 = arith.subf %249, %252 : vector<8x128xf32>
    %254 = math.exp %253 : vector<8x128xf32>
    %cst_128 = arith.constant dense<0.000000e+00> : vector<8xf32>
    %255 = vector.multi_reduction <add>, %254, %cst_128 [1] : vector<8x128xf32> to vector<8xf32>
    %256 = vector.shape_cast %255 : vector<8xf32> to vector<8x1xf32>
    %257 = math.log %256 : vector<8x1xf32>
    %258 = arith.addf %251, %257 : vector<8x1xf32>
    %259 = vector.broadcast %258 : vector<8x1xf32> to vector<8x128xf32>
    %260 = arith.subf %244, %259 : vector<8x128xf32>
    %cst_129 = arith.constant 0.000000e+00 : f32
    %261 = vector.broadcast %cst_129 : f32 to vector<8x128xf32>
    %262 = arith.select %247, %260, %261 : vector<8x128xi1>, vector<8x128xf32>
    %c0_130 = arith.constant 0 : index
    %c0_131 = arith.constant 0 : index
    %263 = vector.load %arg21[%c0_130, %c0_131] : memref<8x128xf32, #tpu.memory_space<vmem>>, vector<8x128xf32>
    tpu.vector_store %arg21[%c0_130, %c0_131], %262 {strides = array<i32>} : memref<8x128xf32, #tpu.memory_space<vmem>>, vector<8x128xf32>,
    return
  }
}

</mosaic_0001>

<bundles_post_ra>
// kernel: tpu_custom_call.1
= control target key start
LH: loop header
LB: loop body
LE: loop exit
PB: predicated region body
PF: predicated region fallthrough
CT: control target
= control target key end

     0   :  { %s1545_s0 = inlined_call_operand.vmem [shape: bf16[8,128], index: 0, kind: input, shape index: {}]   ;;  %s1546_s1 = inlined_call_operand.vmem [shape: bf16[8,8], index: 1, kind: input, shape index: {}]   ;;  %s1547_s2 = inlined_call_operand.vmem [shape: bf16[8,8], index: 2, kind: input, shape index: {}]   ;;  %s1548_s3 = inlined_call_operand.vmem [shape: bf16[128,32], index: 3, kind: input, shape index: {}]   ;;  %s1549_s4 = inlined_call_operand.vmem [shape: f32[1,32], index: 4, kind: input, shape index: {}]   ;;  %s1550_s5 = inlined_call_operand.vmem [shape: bf16[32,64], index: 5, kind: input, shape index: {}]   ;;  %s1551_s6 = inlined_call_operand.vmem [shape: f32[2,32], index: 6, kind: input, shape index: {}]   ;;  %s1552_s7 = inlined_call_operand.vmem [shape: f32[2,32], index: 7, kind: input, shape index: {}]   ;;  %s1553_s8 = inlined_call_operand.vmem [shape: f32[1,64], index: 8, kind: input, shape index: {}]   ;;  %s1554_s9 = inlined_call_operand.vmem [shape: bf16[32,32], index: 9, kind: input, shape index: {}]   ;;  %s1555_s10 = inlined_call_operand.vmem [shape: f32[1,32], index: 10, kind: input, shape index: {}]   ;;  %s1556_s11 = inlined_call_operand.vmem [shape: bf16[128,32], index: 11, kind: input, shape index: {}]   ;;  %s1557_s12 = inlined_call_operand.vmem [shape: f32[1,32], index: 12, kind: input, shape index: {}]   ;;  %s1558_s13 = inlined_call_operand.vmem [shape: bf16[32,64], index: 13, kind: input, shape index: {}]   ;;  %s1559_s14 = inlined_call_operand.vmem [shape: f32[2,32], index: 14, kind: input, shape index: {}]   ;;  %s1560_s15 = inlined_call_operand.vmem [shape: f32[2,32], index: 15, kind: input, shape index: {}]   ;;  %s1561_s16 = inlined_call_operand.vmem [shape: f32[1,64], index: 16, kind: input, shape index: {}]   ;;  %s1562_s17 = inlined_call_operand.vmem [shape: bf16[32,32], index: 17, kind: input, shape index: {}]   ;;  %s1563_s18 = inlined_call_operand.vmem [shape: f32[1,32], index: 18, kind: input, shape index: {}]   ;;  %s1564_s19 = inlined_call_operand.vmem [shape: bf16[128,128], index: 19, kind: input, shape index: {}]   ;;  %s1565_s20 = inlined_call_operand.vmem [shape: f32[1,128], index: 20, kind: input, shape index: {}]   ;;  %s1566_s21 = inlined_call_operand.hbm [shape: f32[8,128], index: 21, kind: output, shape index: {}]  }
   0x1   :  { %1569 = sst [smem:[#allocation6_spill]] %s1545_s0 }
   0x2   :  { %1570 = sst [smem:[#allocation7_spill]] %s1546_s1 }
   0x3   :  { %1571 = sst [smem:[#allocation8_spill]] %s1547_s2 }
   0x4   :  { %1572 = sst [smem:[#allocation9_spill]] %s1548_s3 }
   0x5   :  { %1573 = sst [smem:[#allocation10_spill]] %s1549_s4 }
   0x6   :  { %1574 = sst [smem:[#allocation11_spill]] %s1550_s5 }
   0x7   :  { %s1575_s26 = sld [smem:[#allocation9_spill]] }
   0xd   :  { %v1110_v0 = vld [vmem:[%s1575_s26 + $0x38] sm:$0xff]  ;;  %v1109_v1 = vld [vmem:[%s1575_s26 + $0x30] sm:$0xff]  ;;  %v1108_v2 = vld [vmem:[%s1575_s26 + $0x28] sm:$0xff] }
   0xe   :  { %145 = vmatpush.bf16.msra.mxu0 %v1110_v0 }
  0x12   :  { %146 = vmatpush.bf16.msra.mxu0 %v1109_v1 }
  0x13   :  { %26 = vsyncpa [#allocation4], 0  ;;  %v1107_v3 = vld [vmem:[%s1575_s26 + $0x20] sm:$0xff]  ;;  %v1106_v4 = vld [vmem:[%s1575_s26 + $0x18] sm:$0xff]  ;;  %s1576_s28 = sld [smem:[#allocation11_spill]]  ;;  %vm175_vm0 = vcmask 261120  }
  0x14   :  { %v1105_v5 = vld [vmem:[%s1575_s26 + $0x10] sm:$0xff]  ;;  %v1104_v6 = vld [vmem:[%s1575_s26 + $0x8] sm:$0xff]  ;;  %v1103_v7 = vld [vmem:[%s1575_s26] sm:$0xff]  ;;  %s1577_s4 = sld [smem:[#allocation6_spill]]  ;;  %vm263_vm1 = vcmask 1043456   ;;  %s1205_s29 = smov 96  }
  0x15   :  { %s1578_s1 = sld [smem:[#allocation10_spill]]  ;;  %v1142_v16 = vld [vmem:[%s1551_s6] ss:$0 sm:$0xff]  ;;  %v1144_v28 = vld [vmem:[%s1551_s6 + $0x1] ss:$0 sm:$0xff]  ;;  %vm242_vm4 = vcmask 64512  }
  0x16   :  { %147 = vmatpush.bf16.msra.mxu0 %v1108_v2  ;;  %v1143_v22 = vld [vmem:[%s1552_s7] ss:$0 sm:$0xff]  ;;  %s1579_s30 = sld [smem:[#allocation7_spill]]  ;;  %v1206_v36 = vmov -1e+30   ;;  %v1207_v62 = vmov 0.0  }
  0x17   :  { %v1145_v41 = vld [vmem:[%s1552_s7 + $0x1] ss:$0 sm:$0xff]  ;;  %75 = vst [vmem:[#allocation2] sm:$0xff] %v1207_v62  ;;  %v1146_v63 = vld [vmem:[%s1553_s8] ss:$0 sm:$0xff]  ;;  %s1580_s26 = sld [smem:[#allocation8_spill]] }
  0x18   :  { %s1208_s7 = smov 64   ;;  %vm399_vm9 = vcmask 523520   ;;  %vm464_vm10 = vcmask 785920   ;;  %s956_s2 = sshll.u32 %s1566_s21, 4  ;;  %s957_s2 = int_to_ptr.hbm [resolvable:$true] %s956_s2 }
  0x19   :  { %v1112_v8 = vld [vmem:[%s1576_s28 + $0x8] sm:$0xff]  ;;  %v1111_v10 = vld [vmem:[%s1576_s28] sm:$0xff]  ;;  %s1204_s28 = smov 32  }
  0x1a   :  { %148 = vmatpush.bf16.msra.mxu0 %v1107_v3  ;;  %v76_v9 = vld [vmem:[%s1577_s4] sm:$0xf] }
  0x1b   :  { %v1141_v11 = vld [vmem:[%s1578_s1] ss:$0 sm:$0xff] }
  0x1c   :  { %v70_v29 = vld [vmem:[%s1579_s30] sm:$0xf] }
  0x1d   :  { %v72_v30 = vunpack.c.l.bf16 %v70_v29 }
  0x1e   :  { %149 = vmatpush.bf16.msra.mxu0 %v1106_v4 }
  0x1f   :  { %vm73_vm2 = vcmp.gt.f32.partialorder %v72_v30, 0.0  ;;  %v1122_v30 = vld [vmem:[%s1556_s11 + $0x38] sm:$0xff] }
  0x20   :  { %v1375_v37 = vsel %vm73_vm2, 0.0, %v1206_v36  ;;  %536 = vmatpush.bf16.msra.mxu1 %v1122_v30 }
  0x22   :  { %150 = vmatpush.bf16.msra.mxu0 %v1105_v5 }
  0x26   :  { %151 = vmatpush.bf16.msra.mxu0 %v1104_v6 }
  0x2a   :  { %152 = vmatpush.bf16.msra.mxu0 %v1103_v7 }
  0x2d   :  { %153 = vmatmul.bf16.vlgmr.msra.gmra.mxu0 %v76_v9 }
  0x2e   :  { %185 = vmatpush.bf16.msrb.mxu0 %v1112_v8 }
  0x32   :  { %186 = vmatpush.bf16.msrb.mxu0 %v1111_v10 }
  0xaa   :  { %v154_v12 = vpop.f32.mrf.mxu0 }
  0xab   :  { %v155_v13 = vadd.f32 %v1141_v11, %v154_v12 }
  0xad   :  { %v158_v14 = vpack.c.bf16 %v155_v13, %v155_v13 }
  0xaf   :  { %1005 = vmatmul.msk.bf16.vlgmr.msrb.gmra.mxu0 %vm175_vm0, %v158_v14  ;;  %v404_v23 = vsel %vm263_vm1, %v158_v14, 0  ;;  %v1399_v14 = vld [vmem:[%s1580_s26] sm:$0xf] }
  0xb2   :  { %v156_v15 = vpop.f32.mrf.mxu0 }
 0x12c   :  { %v188_v17 = vpop.f32.mrf.mxu0 }
 0x12d   :  { %v255_v18 = vpack.c.bf16 %v188_v17, %v188_v17  ;;  %v194_v19 = vmul.f32 %v1142_v16, %v188_v17  ;;  %v200_v24 = vmul.f32 %v1143_v22, %v188_v17 }
 0x12f   :  { %v265_v20 = vsel %vm263_vm1, %v255_v18, 0  ;;  %v195_v21 = vsel %vm175_vm0, %v194_v19, 0.0  ;;  %v201_v26 = vsel %vm175_vm0, %v200_v24, 0.0  ;;  %v1147_v24 = vld [vmem:[%s1553_s8] ss:$0 sm:$0xff] }
 0x130   :  { %274 = vmatpush.bf16.msra.mxu2 %v265_v20  ;;  %196 = vadd.xlane.f32.xlu0 %v195_v21  ;;  %v1114_v20 = vld [vmem:[%s1554_s9 + $0x8] sm:$0xff]  ;;  %v1113_v21 = vld [vmem:[%s1554_s9] sm:$0xff] }
 0x134   :  { %413 = vmatpush.bf16.msrb.mxu2 %v404_v23  ;;  %v190_v25 = vpop.f32.mrf.mxu0 }
 0x138   :  { %202 = vadd.xlane.f32.xlu0 %v201_v26 }
 0x1a3   :  { %v197_v27 = vpop.xlane.xlu0 %196 }
 0x1a4   :  { %204 = vxpose.xlu1.b32.start.end [1/1] (short) (narrow) %v197_v27, 8 }
 0x1ab   :  { %v203_v33 = vpop.xlane.xlu0 %202 }
 0x1fe   :  { %288 = vrot.lane.b32.xlu1 %v1144_v28, %s1204_s28 }
 0x206   :  { %367 = vrot.lane.b32.xlu1 %v255_v18, %s1205_s29 }
 0x248   :  { %v220_v31 = vpop.trf.xlu1 }
 0x249   :  { %v236_v32 = vperm.slane %v220_v31, 0  ;;  %v1121_v31 = vld [vmem:[%s1556_s11 + $0x30] sm:$0xff] }
 0x24a   :  { %537 = vmatpush.bf16.msra.mxu1 %v1121_v31 }
 0x24b   :  { %v237_v34 = vadd.f32 %v236_v32, %v203_v33 }
 0x24d   :  { %v239_v35 = vmul.f32 0.2, %v237_v34  ;;  %vm238_vm3 = vcmp.ge.f32.partialorder %v237_v34, 0.0 }
 0x24f   :  { %v240_v38 = vsel %vm238_vm3, %v237_v34, %v239_v35 }
 0x250   :  { %v241_v39 = vadd.f32 %v240_v38, %v1375_v37 }
 0x252   :  { %v243_v40 = vsel %vm242_vm4, %v241_v39, -inf }
 0x253   :  { %244 = vmax.xlane.f32.xlu2 %v243_v40  ;;  %v1148_v40 = vld [vmem:[%s1555_s10] ss:$0 sm:$0xff] }
 0x26b   :  { %302 = vrot.lane.b32.xlu2 %v1145_v41, %s1204_s28 }
 0x270   :  { %v289_v42 = vpop.permute.xlu1 %288 }
 0x271   :  { %v291_v43 = vmul.f32 %v289_v42, %v188_v17 }
 0x273   :  { %293 = vrot.lane.b32.xlu0 %v291_v43, %s1205_s29 }
 0x278   :  { %v368_v44 = vpop.permute.xlu1 %367 }
 0x279   :  { %v376_v45 = vsel %vm263_vm1, %v368_v44, 0 }
 0x27a   :  { %385 = vmatpush.bf16.msra.mxu3 %v376_v45 }
 0x27e   :  { %449 = vmatpush.bf16.msrb.mxu3 %v1114_v20 }
 0x282   :  { %450 = vmatpush.bf16.msrb.mxu3 %v1113_v21 }
 0x2c6   :  { %v245_v46 = vpop.xlane.xlu2 %244 }
 0x2c7   :  { %v246_v47 = vsub.f32 %v241_v39, %v245_v46 }
 0x2c9   :  { %v247_v48 = vmul.f32 1.442695, %v246_v47  ;;  %v1120_v47 = vld [vmem:[%s1556_s11 + $0x28] sm:$0xff] }
 0x2ca   :  { %538 = vmatpush.bf16.msra.mxu1 %v1120_v47 }
 0x2cb   :  { %1158 = vpow2.f32 %v247_v48  ;;  %v1119_v48 = vld [vmem:[%s1556_s11 + $0x20] sm:$0xff] }
 0x2ce   :  { %v303_v49 = vpop.permute.xlu2 %302  ;;  %539 = vmatpush.bf16.msra.mxu1 %v1119_v48 }
 0x2cf   :  { %v305_v50 = vmul.f32 %v303_v49, %v188_v17  ;;  %v1118_v49 = vld [vmem:[%s1556_s11 + $0x18] sm:$0xff] }
 0x2d1   :  { %v1159_v51 = vpop.eup %1158  ;;  %307 = vrot.lane.b32.xlu2 %v305_v50, %s1205_s29  ;;  %v1117_v50 = vld [vmem:[%s1556_s11 + $0x10] sm:$0xff] }
 0x2d2   :  { %v249_v52 = vsel %vm242_vm4, %v1159_v51, 0.0  ;;  %540 = vmatpush.bf16.msra.mxu1 %v1118_v49 }
 0x2d3   :  { %250 = vadd.xlane.f32.xlu0 %v249_v52  ;;  %v1115_v52 = vld [vmem:[%s1556_s11] sm:$0xff] }
 0x2d6   :  { %541 = vmatpush.bf16.msra.mxu1 %v1117_v50 }
 0x2e5   :  { %v294_v53 = vpop.permute.xlu0 %293 }
 0x2e6   :  { %v296_v54 = vsel %vm175_vm0, %v294_v53, 0.0  ;;  %v1124_v53 = vld [vmem:[%s1558_s13 + $0x8] sm:$0xff] }
 0x2fa   :  { %297 = vadd.xlane.f32.xlu2 %v296_v54 }
 0x32b   :  { %v308_v55 = vpop.permute.xlu2 %307 }
 0x32c   :  { %v310_v56 = vsel %vm175_vm0, %v308_v55, 0.0 }
 0x32d   :  { %311 = vadd.xlane.f32.xlu0 %v310_v56 }
 0x346   :  { %v251_v57 = vpop.xlane.xlu0 %250 }
 0x347   :  { %1160 = vrcp.f32 %v251_v57 }
 0x34d   :  { %v1161_v58 = vpop.eup %1160 }
 0x34e   :  { %v253_v59 = vmul.f32 %v1161_v58, %v1159_v51  ;;  %v1116_v51 = vld [vmem:[%s1556_s11 + $0x8] sm:$0xff]  ;;  %v1123_v58 = vld [vmem:[%s1558_s13] sm:$0xff] }
 0x34f   :  { %542 = vmatpush.bf16.msra.mxu1 %v1116_v51 }
 0x350   :  { %v254_v60 = vpack.c.bf16 %v253_v59, %v253_v59  ;;  %v1150_v59 = vld [vmem:[%s1559_s14 + $0x1] ss:$0 sm:$0xff] }
 0x352   :  { %1006 = vmatmul.msk.bf16.vlgmr.msra.gmra.mxu2 %vm242_vm4, %v254_v60  ;;  %v1151_v60 = vld [vmem:[%s1560_s15 + $0x1] ss:$0 sm:$0xff] }
 0x353   :  { %543 = vmatpush.bf16.msra.mxu1 %v1115_v52  ;;  %575 = vmatpush.bf16.msra.mxu2 %v1124_v53  ;;  %v1126_v53 = vld [vmem:[%s1562_s17 + $0x8] sm:$0xff] }
 0x357   :  { %576 = vmatpush.bf16.msra.mxu2 %v1123_v58  ;;  %v1154_v58 = vld [vmem:[%s1561_s16] ss:$0 sm:$0xff] }
 0x362   :  { %1008 = vmatmul.msk.bf16.vlgmr.msrb.gmra.mxu2 %vm242_vm4, %v1399_v14 }
 0x36d   :  { %v298_v61 = vpop.xlane.xlu2 %297 }
 0x36e   :  { %313 = vxpose.xlu2.b32.start.end [1/1] (short) (narrow) %v298_v61, 8  ;;  %v1149_v61 = vld [vmem:[%s1557_s12] ss:$0 sm:$0xff] }
 0x3a0   :  { %v312_v8 = vpop.xlane.xlu0 %311 }
 0x3d5   :  { %v276_v0 = vpop.f32.mrf.mxu2 }
 0x3d6   :  { %v277_v1 = vadd.f32 %v1146_v63, %v276_v0 }
 0x3d8   :  { %vm280_vm5 = vcmp.ge.f32.partialorder %v277_v1, 0.0  ;;  %v281_v2 = vmul.f32 0.01, %v277_v1 }
 0x3da   :  { %v282_v3 = vsel %vm280_vm5, %v277_v1, %v281_v2 }
 0x3db   :  { %v283_v4 = vmax.f32 %v282_v3, 0.0  ;;  %v1152_v3 = vld [vmem:[%s1559_s14] ss:$0 sm:$0xff] }
 0x3dd   :  { %v278_v5 = vpop.f32.mrf.mxu2  ;;  %284 = vst.msk [vmem:[#allocation2] sm:$0xff] %vm175_vm0, %v283_v4 }
 0x3e5   :  { %v415_v22 = vpop.f32.mrf.mxu2 }
 0x3e6   :  { %v419_v29 = vpack.c.bf16 %v415_v22, %v415_v22 }
 0x3ed   :  { %v417_v23 = vpop.f32.mrf.mxu2 }
 0x407   :  { %v329_v6 = vpop.trf.xlu2 }
 0x408   :  { %v345_v7 = vperm.slane %v329_v6, 0 }
 0x40a   :  { %v346_v9 = vadd.f32 %v345_v7, %v312_v8 }
 0x40c   :  { %v348_v10 = vmul.f32 0.2, %v346_v9  ;;  %vm347_vm6 = vcmp.ge.f32.partialorder %v346_v9, 0.0 }
 0x40e   :  { %v349_v11 = vsel %vm347_vm6, %v346_v9, %v348_v10 }
 0x40f   :  { %v350_v12 = vadd.f32 %v349_v11, %v1375_v37 }
 0x411   :  { %v351_v13 = vsel %vm242_vm4, %v350_v12, -inf }
 0x412   :  { %352 = vmax.xlane.f32.xlu0 %v351_v13 }
 0x485   :  { %v353_v15 = vpop.xlane.xlu0 %352 }
 0x486   :  { %v354_v16 = vsub.f32 %v350_v12, %v353_v15 }
 0x488   :  { %v355_v17 = vmul.f32 1.442695, %v354_v16 }
 0x48a   :  { %1162 = vpow2.f32 %v355_v17 }
 0x490   :  { %v1163_v18 = vpop.eup %1162 }
 0x491   :  { %v357_v19 = vsel %vm242_vm4, %v1163_v18, 0.0 }
 0x492   :  { %358 = vadd.xlane.f32.xlu0 %v357_v19 }
 0x4a6   :  { %369 = vrot.lane.b32.xlu0 %v1147_v24, %s1205_s29 }
 0x4ae   :  { %676 = vrot.lane.b32.xlu0 %v1150_v59, %s1204_s28 }
 0x505   :  { %v359_v25 = vpop.xlane.xlu0 %358 }
 0x506   :  { %1164 = vrcp.f32 %v359_v25 }
 0x50c   :  { %v1165_v26 = vpop.eup %1164 }
 0x50d   :  { %v361_v27 = vmul.f32 %v1165_v26, %v1163_v18 }
 0x50f   :  { %v362_v28 = vpack.c.bf16 %v361_v27, %v361_v27 }
 0x511   :  { %1007 = vmatmul.msk.bf16.vlgmr.msra.gmra.mxu3 %vm242_vm4, %v362_v28 }
 0x518   :  { %v370_v32 = vpop.permute.xlu0 %369 }
 0x520   :  { %v677_v5 = vpop.permute.xlu0 %676 }
 0x521   :  { %1017 = vmatmul.msk.bf16.vlgmr.msrb.gmra.mxu3 %vm175_vm0, %v419_v29 }
 0x594   :  { %v387_v33 = vpop.f32.mrf.mxu3 }
 0x595   :  { %v388_v34 = vadd.f32 %v387_v33, %v370_v32 }
 0x597   :  { %vm391_vm7 = vcmp.ge.f32.partialorder %v388_v34, 0.0  ;;  %v392_v35 = vmul.f32 0.01, %v388_v34 }
 0x599   :  { %v393_v36 = vsel %vm391_vm7, %v388_v34, %v392_v35 }
 0x59a   :  { %v394_v38 = vmax.f32 %v393_v36, 0.0 }
 0x59c   :  { %v389_v39 = vpop.f32.mrf.mxu3  ;;  %396 = vrot.lane.b32.xlu1 %v394_v38, %s1204_s28 }
 0x5a4   :  { %v452_v41 = vpop.f32.mrf.mxu3 }
 0x5a5   :  { %v453_v42 = vadd.f32 %v1148_v40, %v452_v41 }
 0x5a7   :  { %vm456_vm8 = vcmp.ge.f32.partialorder %v453_v42, 0.0  ;;  %v457_v43 = vmul.f32 0.01, %v453_v42 }
 0x5a9   :  { %v458_v44 = vsel %vm456_vm8, %v453_v42, %v457_v43 }
 0x5aa   :  { %v459_v45 = vmax.f32 %v458_v44, 0.0 }
 0x5ac   :  { %v454_v46 = vpop.f32.mrf.mxu3  ;;  %461 = vrot.lane.b32.xlu1 %v459_v45, %s1208_s7 }
 0x5b4   :  { %690 = vrot.lane.b32.xlu1 %v1151_v60, %s1204_s28 }
 0x60e   :  { %v397_v54 = vpop.permute.xlu1 %396 }
 0x60f   :  { %400 = vst.msk [vmem:[#allocation2] sm:$0xff] %vm399_vm9, %v397_v54  ;;  %v1125_v54 = vld [vmem:[%s1562_s17] sm:$0xff] }
 0x61e   :  { %v462_v55 = vpop.permute.xlu1 %461 }
 0x61f   :  { %465 = vst.msk [vmem:[#allocation2] sm:$0xff] %vm464_vm10, %v462_v55 }
 0x626   :  { %v466_v56 = vld [vmem:[#allocation2] sm:$0xff]  ;;  %v691_v4 = vpop.permute.xlu1 %690 }
 0x627   :  { %v467_v57 = vpack.c.bf16 %v466_v56, %v466_v56 }
 0x629   :  { %544 = vmatmul.bf16.vlgmr.msra.gmra.mxu1 %v467_v57 }
 0x6a6   :  { %v545_v62 = vpop.f32.mrf.mxu1 }
 0x6a7   :  { %v546_v63 = vadd.f32 %v1149_v61, %v545_v62 }
 0x6a9   :  { %v549_v0 = vpack.c.bf16 %v546_v63, %v546_v63 }
 0x6ab   :  { %v788_v1 = vsel %vm263_vm1, %v549_v0, 0  ;;  %1058 = vmatmul.msk.bf16.vlgmr.msra.gmra.mxu2 %vm175_vm0, %v549_v0 }
 0x6ac   :  { %797 = vmatpush.bf16.msrb.mxu2 %v788_v1  ;;  %v1155_v1 = vld [vmem:[%s1561_s16] ss:$0 sm:$0xff] }
 0x6ae   :  { %v547_v2 = vpop.f32.mrf.mxu1 }
 0x6bb   :  { %1061 = vmatmul.msk.bf16.vlgmr.msrb.gmra.mxu2 %vm242_vm4, %v1399_v14  ;;  %v1153_v14 = vld [vmem:[%s1560_s15] ss:$0 sm:$0xff] }
 0x72e   :  { %v578_v6 = vpop.f32.mrf.mxu2 }
 0x72f   :  { %v693_v7 = vmul.f32 %v691_v4, %v578_v6  ;;  %v679_v8 = vmul.f32 %v677_v5, %v578_v6  ;;  %v644_v9 = vpack.c.bf16 %v578_v6, %v578_v6  ;;  %v584_v10 = vmul.f32 %v1152_v3, %v578_v6 }
 0x730   :  { %v590_v15 = vmul.f32 %v1153_v14, %v578_v6 }
 0x731   :  { %695 = vrot.lane.b32.xlu0 %v693_v7, %s1205_s29  ;;  %681 = vrot.lane.b32.xlu2 %v679_v8, %s1205_s29  ;;  %v653_v11 = vsel %vm263_vm1, %v644_v9, 0  ;;  %v585_v12 = vsel %vm175_vm0, %v584_v10, 0.0  ;;  %v1134_v10 = vld [vmem:[%s1564_s19 + $0x38] sm:$0xff] }
 0x732   :  { %662 = vmatpush.bf16.msra.mxu3 %v653_v11  ;;  %586 = vadd.xlane.f32.xlu1 %v585_v12  ;;  %v591_v16 = vsel %vm175_vm0, %v590_v15, 0.0  ;;  %v1133_v11 = vld [vmem:[%s1564_s19 + $0x30] sm:$0xff]  ;;  %v1132_v12 = vld [vmem:[%s1564_s19 + $0x28] sm:$0xff]  ;;  %v1156_v15 = vld [vmem:[%s1563_s18] ss:$0 sm:$0xff] }
 0x733   :  { %919 = vmatpush.bf16.msrb.mxu1 %v1134_v10 }
 0x736   :  { %v580_v13 = vpop.f32.mrf.mxu2  ;;  %833 = vmatpush.bf16.msrb.mxu3 %v1126_v53 }
 0x737   :  { %920 = vmatpush.bf16.msrb.mxu1 %v1133_v11  ;;  %v1131_v13 = vld [vmem:[%s1564_s19 + $0x20] sm:$0xff] }
 0x73a   :  { %834 = vmatpush.bf16.msrb.mxu3 %v1125_v54 }
 0x73b   :  { %921 = vmatpush.bf16.msrb.mxu1 %v1132_v12 }
 0x73e   :  { %v799_v55 = vpop.f32.mrf.mxu2 }
 0x73f   :  { %v803_v56 = vpack.c.bf16 %v799_v55, %v799_v55  ;;  %922 = vmatpush.bf16.msrb.mxu1 %v1131_v13 }
 0x746   :  { %v801_v57 = vpop.f32.mrf.mxu2 }
 0x75b   :  { %592 = vadd.xlane.f32.xlu0 %v591_v16 }
 0x78b   :  { %v682_v17 = vpop.permute.xlu2 %681 }
 0x78c   :  { %v684_v18 = vsel %vm175_vm0, %v682_v17, 0.0 }
 0x78d   :  { %685 = vadd.xlane.f32.xlu1 %v684_v18 }
 0x7a3   :  { %v696_v19 = vpop.permute.xlu0 %695 }
 0x7a4   :  { %v698_v20 = vsel %vm175_vm0, %v696_v19, 0.0 }
 0x7a5   :  { %699 = vadd.xlane.f32.xlu0 %v698_v20  ;;  %v587_v21 = vpop.xlane.xlu1 %586 }
 0x7c7   :  { %594 = vxpose.xlu1.b32.start.end [1/1] (short) (narrow) %v587_v21, 8 }
 0x7ce   :  { %v593_v25 = vpop.xlane.xlu0 %592 }
 0x800   :  { %v686_v22 = vpop.xlane.xlu1 %685 }
 0x801   :  { %701 = vxpose.xlu0.b32.start.end [1/1] (short) (narrow) %v686_v22, 8 }
 0x818   :  { %v700_v31 = vpop.xlane.xlu0 %699 }
 0x86b   :  { %v610_v23 = vpop.trf.xlu1 }
 0x86c   :  { %v626_v24 = vperm.slane %v610_v23, 0 }
 0x86e   :  { %v627_v26 = vadd.f32 %v626_v24, %v593_v25 }
 0x870   :  { %v629_v27 = vmul.f32 0.2, %v627_v26  ;;  %vm628_vm11 = vcmp.ge.f32.partialorder %v627_v26, 0.0 }
 0x872   :  { %v630_v28 = vsel %vm628_vm11, %v627_v26, %v629_v27  ;;  %v1130_v26 = vld [vmem:[%s1564_s19 + $0x18] sm:$0xff]  ;;  %v1129_v27 = vld [vmem:[%s1564_s19 + $0x10] sm:$0xff] }
 0x873   :  { %v631_v29 = vadd.f32 %v630_v28, %v1375_v37  ;;  %923 = vmatpush.bf16.msrb.mxu1 %v1130_v26  ;;  %v1128_v28 = vld [vmem:[%s1564_s19 + $0x8] sm:$0xff] }
 0x875   :  { %v632_v30 = vsel %vm242_vm4, %v631_v29, -inf }
 0x876   :  { %633 = vmax.xlane.f32.xlu2 %v632_v30 }
 0x877   :  { %924 = vmatpush.bf16.msrb.mxu1 %v1129_v27 }
 0x87b   :  { %925 = vmatpush.bf16.msrb.mxu1 %v1128_v28 }
 0x8a5   :  { %v717_v32 = vpop.trf.xlu0 }
 0x8a6   :  { %v733_v33 = vperm.slane %v717_v32, 0 }
 0x8a8   :  { %v734_v34 = vadd.f32 %v733_v33, %v700_v31 }
 0x8aa   :  { %v736_v35 = vmul.f32 0.2, %v734_v34  ;;  %vm735_vm12 = vcmp.ge.f32.partialorder %v734_v34, 0.0 }
 0x8ac   :  { %v737_v36 = vsel %vm735_vm12, %v734_v34, %v736_v35  ;;  %v932_v34 = vlaneseq }
 0x8ad   :  { %v738_v38 = vadd.f32 %v737_v36, %v1375_v37  ;;  %v1157_v36 = vld [vmem:[%s1565_s20] ss:$0 sm:$0xff] }
 0x8ae   :  { %v933_v35 = vand.u32 127, %v932_v34 }
 0x8af   :  { %v739_v39 = vsel %vm242_vm4, %v738_v38, -inf }
 0x8b0   :  { %740 = vmax.xlane.f32.xlu0 %v739_v39 }
 0x8e9   :  { %v634_v40 = vpop.xlane.xlu2 %633 }
 0x8ea   :  { %v635_v41 = vsub.f32 %v631_v29, %v634_v40  ;;  %v1127_v29 = vld [vmem:[%s1564_s19] sm:$0xff]  ;;  %s1209_s19 = smov [#allocation3]  }
 0x8eb   :  { %926 = vmatpush.bf16.msrb.mxu1 %v1127_v29  ;;  %s954_s20 = sshll.u32 %s1209_s19, 4  ;;  %s955_s20 = int_to_ptr.vmem [resolvable:$true] %s954_s20 }
 0x8ec   :  { %v636_v42 = vmul.f32 1.442695, %v635_v41 }
 0x8ee   :  { %1166 = vpow2.f32 %v636_v42 }
 0x8f4   :  { %v1167_v43 = vpop.eup %1166 }
 0x8f5   :  { %v638_v44 = vsel %vm242_vm4, %v1167_v43, 0.0 }
 0x8f6   :  { %639 = vadd.xlane.f32.xlu1 %v638_v44 }
 0x923   :  { %v741_v45 = vpop.xlane.xlu0 %740 }
 0x924   :  { %v742_v46 = vsub.f32 %v738_v38, %v741_v45 }
 0x926   :  { %v743_v47 = vmul.f32 1.442695, %v742_v46 }
 0x928   :  { %1168 = vpow2.f32 %v743_v47 }
 0x92e   :  { %v1169_v48 = vpop.eup %1168 }
 0x92f   :  { %v745_v49 = vsel %vm242_vm4, %v1169_v48, 0.0 }
 0x930   :  { %746 = vadd.xlane.f32.xlu2 %v745_v49 }
 0x948   :  { %755 = vrot.lane.b32.xlu2 %v644_v9, %s1205_s29 }
 0x950   :  { %757 = vrot.lane.b32.xlu2 %v1154_v58, %s1205_s29 }
 0x969   :  { %v640_v37 = vpop.xlane.xlu1 %639 }
 0x96a   :  { %1170 = vrcp.f32 %v640_v37 }
 0x970   :  { %v1171_v50 = vpop.eup %1170 }
 0x971   :  { %v642_v51 = vmul.f32 %v1171_v50, %v1167_v43 }
 0x973   :  { %v643_v52 = vpack.c.bf16 %v642_v51, %v642_v51 }
 0x975   :  { %1059 = vmatmul.msk.bf16.vlgmr.msra.gmra.mxu3 %vm242_vm4, %v643_v52 }
 0x985   :  { %1070 = vmatmul.msk.bf16.vlgmr.msrb.gmra.mxu3 %vm175_vm0, %v803_v56 }
 0x9a3   :  { %v747_v59 = vpop.xlane.xlu2 %746 }
 0x9a4   :  { %1172 = vrcp.f32 %v747_v59 }
 0x9aa   :  { %v1173_v60 = vpop.eup %1172 }
 0x9ab   :  { %v749_v61 = vmul.f32 %v1173_v60, %v1169_v48  ;;  %v756_v62 = vpop.permute.xlu2 %755 }
 0x9ac   :  { %v764_v63 = vsel %vm263_vm1, %v756_v62, 0 }
 0x9ad   :  { %v750_v0 = vpack.c.bf16 %v749_v61, %v749_v61  ;;  %773 = vmatpush.bf16.msra.mxu0 %v764_v63 }
 0x9b0   :  { %1060 = vmatmul.msk.bf16.vlgmr.msra.gmra.mxu0 %vm242_vm4, %v750_v0 }
 0x9b3   :  { %v758_v14 = vpop.permute.xlu2 %757 }
 0x9f8   :  { %v664_v2 = vpop.f32.mrf.mxu3 }
 0x9f9   :  { %v665_v3 = vadd.f32 %v1155_v1, %v664_v2 }
 0x9fb   :  { %vm668_vm13 = vcmp.ge.f32.partialorder %v665_v3, 0.0  ;;  %v669_v4 = vmul.f32 0.01, %v665_v3 }
 0x9fd   :  { %v670_v5 = vsel %vm668_vm13, %v665_v3, %v669_v4 }
 0x9fe   :  { %v671_v6 = vmax.f32 %v670_v5, 0.0 }
 0xa00   :  { %672 = vst.msk [vmem:[#allocation2] sm:$0xff] %vm175_vm0, %v671_v6  ;;  %v666_v7 = vpop.f32.mrf.mxu3  ;;  %vm934_vm0 = vcmp.lt.s32.totalorder %v933_v35, 4 }
 0xa08   :  { %v836_v8 = vpop.f32.mrf.mxu3 }
 0xa09   :  { %v837_v19 = vadd.f32 %v1156_v15, %v836_v8 }
 0xa0b   :  { %v841_v22 = vmul.f32 0.01, %v837_v19  ;;  %vm840_vm15 = vcmp.ge.f32.partialorder %v837_v19, 0.0 }
 0xa0d   :  { %v842_v24 = vsel %vm840_vm15, %v837_v19, %v841_v22 }
 0xa0e   :  { %v843_v25 = vmax.f32 %v842_v24, 0.0 }
 0xa10   :  { %v838_v9 = vpop.f32.mrf.mxu3 }
 0xa2d   :  { %v775_v16 = vpop.f32.mrf.mxu0 }
 0xa2e   :  { %v776_v17 = vadd.f32 %v775_v16, %v758_v14 }
 0xa30   :  { %vm779_vm14 = vcmp.ge.f32.partialorder %v776_v17, 0.0  ;;  %v780_v18 = vmul.f32 0.01, %v776_v17 }
 0xa32   :  { %v781_v20 = vsel %vm779_vm14, %v776_v17, %v780_v18 }
 0xa33   :  { %v782_v21 = vmax.f32 %v781_v20, 0.0 }
 0xa35   :  { %v777_v23 = vpop.f32.mrf.mxu0  ;;  %784 = vrot.lane.b32.xlu2 %v782_v21, %s1204_s28 }
 0xa3d   :  { %845 = vrot.lane.b32.xlu2 %v843_v25, %s1208_s7 }
 0xa8f   :  { %v785_v30 = vpop.permute.xlu2 %784 }
 0xa90   :  { %787 = vst.msk [vmem:[#allocation2] sm:$0xff] %vm399_vm9, %v785_v30 }
 0xa97   :  { %v846_v31 = vpop.permute.xlu2 %845 }
 0xa98   :  { %848 = vst.msk [vmem:[#allocation2] sm:$0xff] %vm464_vm10, %v846_v31 }
 0xa9f   :  { %v849_v32 = vld [vmem:[#allocation2] sm:$0xff] }
 0xaa0   :  { %v850_v33 = vpack.c.bf16 %v849_v32, %v849_v32 }
 0xaa2   :  { %927 = vmatmul.bf16.vlgmr.msrb.gmra.mxu1 %v850_v33 }
 0xb1f   :  { %v928_v38 = vpop.f32.mrf.mxu1 }
 0xb20   :  { %v929_v39 = vadd.f32 %v1157_v36, %v928_v38 }
 0xb22   :  { %v935_v40 = vsel %vm934_vm0, %v929_v39, -1e+30 }
 0xb23   :  { %936 = vmax.xlane.f32.xlu2 %v935_v40 }
 0xb27   :  { %v930_v41 = vpop.f32.mrf.mxu1 }
 0xb96   :  { %v937_v42 = vpop.xlane.xlu2 %936 }
 0xb97   :  { %v938_v43 = vsub.f32 %v935_v40, %v937_v42 }
 0xb99   :  { %v939_v44 = vmul.f32 1.442695, %v938_v43 }
 0xb9b   :  { %1174 = vpow2.f32 %v939_v44 }
 0xba1   :  { %v1175_v45 = vpop.eup %1174 }
 0xba2   :  { %941 = vadd.xlane.f32.xlu1 %v1175_v45 }
 0xc15   :  { %v942_v46 = vpop.xlane.xlu1 %941 }
 0xc16   :  { %1176 = vlog2.f32 %v942_v46 }
 0xc1c   :  { %v1177_v47 = vpop.eup %1176 }
 0xc1d   :  { %v944_v48 = vmul.f32 0.6931472, %v1177_v47 }
 0xc1f   :  { %v945_v49 = vadd.f32 %v944_v48, %v937_v42 }
 0xc21   :  { %v946_v37 = vsub.f32 %v929_v39, %v945_v49 }
 0xc23   :  { %v947_v50 = vsel %vm934_vm0, %v946_v37, 0.0 }
 0xc24   :  { %948 = vst [vmem:[#allocation3] sm:$0xff] %v947_v50 }
 0xc25   :  { %959 = dma.vmem_to_hbm [thread:$0]  %s955_s20, 128, %s957_s2, [#allocation4]  }
 0xc26   :  { %1202 = dma.done.wait [#allocation4], 128  }
 0xc27   :  { %1203 = vsyncadd [#allocation4], 4294967168 }
 0xc28   :  { %964 = vsyncpa [#allocation4], 1 }

</bundles_post_ra>
